<compile_context>
chip_gen: v7x
topology: tpu7x:2x2x1
jax: 0.10.0
libtpu: 0.0.40
codegen_flags: <defaults>
</compile_context>

<pallas_src>
import jax
import jax.numpy as jnp
from jax.experimental import pallas as pl
from jax.experimental.pallas import tpu as pltpu


# Fixed hidden widths of the module (am -> fc2 ... fc7).
_HIDDEN = (32, 64, 128, 512, 128, 64)
_NEG_BIG = -1e30  # bias for padded softmax lanes -> exp underflows to exactly 0


def _round_up(x, m):
    return ((x + m - 1) // m) * m


def actor2_kernel(x_ref, b_ref,
                  wam_ref, w2_ref, w3_ref, w4_ref, w5_ref, w6_ref, w7_ref,
                  out_ref):
    """Whole MLP + softmax for one batch tile; weights/biases VMEM-resident."""

    def layer(h, w_ref, k, relu=True):
        n = w_ref.shape[1]
        b = b_ref[k:k + 1, 0:n]                              # [1, n] static slice (f32)
        # bf16 operands into the MXU, f32 accumulation / epilogue.
        y = jnp.dot(h.astype(jnp.bfloat16), w_ref[...],
                    preferred_element_type=jnp.float32) + b
        return jnp.maximum(y, 0.0) if relu else y

    h = x_ref[...]                                           # [tile_m, S] f32
    h = layer(h, wam_ref, 0)                                 # am  : S   -> 32
    h = layer(h, w2_ref, 1)                                  # fc2 : 32  -> 64
    h = layer(h, w3_ref, 2)                                  # fc3 : 64  -> 128
    h = layer(h, w4_ref, 3)                                  # fc4 : 128 -> 512
    h = layer(h, w5_ref, 4)                                  # fc5 : 512 -> 128
    h = layer(h, w6_ref, 5)                                  # fc6 : 128 -> 64
    logits = layer(h, w7_ref, 6, relu=False)                 # fc7 : 64  -> Ap (lane-dense)

    # Numerically stable softmax over the action dim.  Padded lanes carry a
    # -1e30 bias, so exp() underflows to 0 and they drop out of the sum.
    m = jnp.max(logits, axis=-1, keepdims=True)
    e = jnp.exp(logits - m)
    denom = jnp.sum(e, axis=-1, keepdims=True)
    out_ref[...] = e * pl.reciprocal(denom, approx=False)    # reciprocal + mul


def init_linear(key, fan_in, fan_out):
    """Deterministic PyTorch-style uniform(-1/sqrt(fan_in), 1/sqrt(fan_in)) init."""
    kw, kb = jax.random.split(key)
    bound = 1.0 / (fan_in ** 0.5)
    w = jax.random.uniform(kw, (fan_in, fan_out), jnp.float32, -bound, bound)
    b = jax.random.uniform(kb, (fan_out,), jnp.float32, -bound, bound)
    return w, b


def make_actor2_params(key, state_size, action_size):
    dims = [(state_size, _HIDDEN[0])]                        # am (deterministic here)
    dims += list(zip(_HIDDEN[:-1], _HIDDEN[1:]))             # fc2 .. fc6
    dims += [(_HIDDEN[-1], action_size)]                     # fc7
    keys = jax.random.split(key, len(dims))
    return [init_linear(k, fi, fo) for k, (fi, fo) in zip(keys, dims)]


def actor2_forward(states, params, *, tile_m=512):
    """states: f32[B, state_size] (or f32[state_size]) -> probabilities f32[B, action_size]."""
    states = jnp.asarray(states, jnp.float32)
    squeeze = states.ndim == 1
    if squeeze:
        states = states[None, :]
    B, S = states.shape
    A = params[-1][0].shape[1]
    Ap = _round_up(A, 128)                                   # lane-dense output width

    # Batch tile: multiple of 8 sublanes, no larger than the (8-padded) batch.
    Bp8 = _round_up(B, 8)
    tile_m = _round_up(max(8, min(tile_m, Bp8)), 8)
    # Guarantee >= 2 grid steps whenever the batch allows it, so the
    # ("parallel",) axis can be split across v7x's two TensorCores.
    if Bp8 >= 16:
        tile_m = min(tile_m, _round_up(Bp8 // 2, 8))
    Bp = _round_up(B, tile_m)
    if Bp != B:
        states = jnp.pad(states, ((0, Bp - B), (0, 0)))

    # Pack all biases into one small f32 buffer: row k = bias of layer k.
    # Row of fc7 is padded with -1e30 beyond A so padded softmax lanes vanish.
    max_out = max(max(b.shape[0] for _, b in params), Ap)
    bias_buf = jnp.zeros((_round_up(len(params), 8), _round_up(max_out, 128)),
                         jnp.float32)
    for k, (_, b) in enumerate(params):
        bias_buf = bias_buf.at[k, :b.shape[0]].set(b.astype(jnp.float32))
    bias_buf = bias_buf.at[len(params) - 1, A:Ap].set(_NEG_BIG)

    # bf16 weights for the MXU; pad fc7 columns to Ap with zeros (lane-dense).
    weights = [w.astype(jnp.bfloat16) for w, _ in params[:-1]]
    w7 = params[-1][0]
    w7p = jnp.zeros((w7.shape[0], Ap), jnp.float32).at[:, :A].set(w7)
    weights.append(w7p.astype(jnp.bfloat16))

    grid = (Bp // tile_m,)
    in_specs = [pl.BlockSpec((tile_m, S), lambda i: (i, 0)),          # per-tile rows
                pl.BlockSpec(bias_buf.shape, lambda i: (0, 0))]       # resident
    in_specs += [pl.BlockSpec(w.shape, lambda i: (0, 0)) for w in weights]  # resident
    out_specs = pl.BlockSpec((tile_m, Ap), lambda i: (i, 0))          # lane-dense store

    out = pl.pallas_call(
        actor2_kernel,
        out_shape=jax.ShapeDtypeStruct((Bp, Ap), jnp.float32),
        grid=grid,
        in_specs=in_specs,
        out_specs=out_specs,
        compiler_params=pltpu.CompilerParams(
            dimension_semantics=("parallel",)),
    )(states, bias_buf, *weights)

    out = out[:B, :A]
    return out[0] if squeeze else out


def actor2_ref(states, params):
    """Pure-JAX reference (mirrors the kernel's bf16-operand matmuls)."""
    h = jnp.asarray(states, jnp.float32)
    if h.ndim == 1:
        h = h[None, :]
    for idx, (w, b) in enumerate(params):
        h = jnp.dot(h.astype(jnp.bfloat16), w.astype(jnp.bfloat16),
                    preferred_element_type=jnp.float32) + b[None, :].astype(jnp.float32)
        if idx < len(params) - 1:
            h = jnp.maximum(h, 0.0)
    h = h - jnp.max(h, axis=-1, keepdims=True)
    e = jnp.exp(h)
    return e / jnp.sum(e, axis=-1, keepdims=True)


if __name__ == "__main__":
    state_size = 8
    action_size = 8
    batch = 32

    key = jax.random.PRNGKey(0)
    k_state, k_params = jax.random.split(key)

    states = jax.random.normal(k_state, (batch, state_size), jnp.float32)
    params = make_actor2_params(k_params, state_size, action_size)

    # Default tile_m=512 is clamped to the batch and then halved to 16 so the
    # grid has 2 steps (exercises VMEM-resident weights + dual-TC sharding).
    probs = actor2_forward(states, params)
    probs = jax.block_until_ready(probs)

    ref = actor2_ref(states, params)
    assert probs.shape == (batch, action_size)
    assert jnp.allclose(jnp.sum(probs, axis=-1), 1.0, atol=1e-5)
    assert jnp.allclose(probs, ref, atol=2e-4, rtol=1e-3)

    print("KERNEL_OK")
</pallas_src>

<mosaic_0001>
module attributes {stable_mosaic.version = 11 : i64} {
  func.func @actor2_kernel(%arg0: i32, %arg1: memref<16x8xf32, #tpu.memory_space<vmem>>, %arg2: memref<8x512xf32, #tpu.memory_space<vmem>>, %arg3: memref<8x32xbf16, #tpu.memory_space<vmem>>, %arg4: memref<32x64xbf16, #tpu.memory_space<vmem>>, %arg5: memref<64x128xbf16, #tpu.memory_space<vmem>>, %arg6: memref<128x512xbf16, #tpu.memory_space<vmem>>, %arg7: memref<512x128xbf16, #tpu.memory_space<vmem>>, %arg8: memref<128x64xbf16, #tpu.memory_space<vmem>>, %arg9: memref<64x128xbf16, #tpu.memory_space<vmem>>, %arg10: memref<16x128xf32, #tpu.memory_space<vmem>>) attributes {dimension_semantics = [#tpu.dimension_semantics<parallel>], iteration_bounds = array<i64: 2>, scalar_prefetch = 0 : i64, scratch_operands = 0 : i64, tpu.core_type = #tpu.core_type<tc>, window_params = [{transform_indices = @transform_0, window_bounds = array<i64: 16, 8>}, {pipeline_mode = #tpu.pipeline_mode<synchronous>, transform_indices = @transform_1, window_bounds = array<i64: 8, 512>}, {pipeline_mode = #tpu.pipeline_mode<synchronous>, transform_indices = @transform_2, window_bounds = array<i64: 8, 32>}, {pipeline_mode = #tpu.pipeline_mode<synchronous>, transform_indices = @transform_3, window_bounds = array<i64: 32, 64>}, {pipeline_mode = #tpu.pipeline_mode<synchronous>, transform_indices = @transform_4, window_bounds = array<i64: 64, 128>}, {pipeline_mode = #tpu.pipeline_mode<synchronous>, transform_indices = @transform_5, window_bounds = array<i64: 128, 512>}, {pipeline_mode = #tpu.pipeline_mode<synchronous>, transform_indices = @transform_6, window_bounds = array<i64: 512, 128>}, {pipeline_mode = #tpu.pipeline_mode<synchronous>, transform_indices = @transform_7, window_bounds = array<i64: 128, 64>}, {pipeline_mode = #tpu.pipeline_mode<synchronous>, transform_indices = @transform_8, window_bounds = array<i64: 64, 128>}, {transform_indices = @transform_9, window_bounds = array<i64: 16, 128>}]} {
    %c0 = arith.constant 0 : index
    %c0_0 = arith.constant 0 : index
    %0 = vector.load %arg1[%c0, %c0_0] : memref<16x8xf32, #tpu.memory_space<vmem>>, vector<16x8xf32>
    %c0_1 = arith.constant 0 : index
    %c0_2 = arith.constant 0 : index
    %1 = vector.load %arg2[%c0_1, %c0_2] : memref<8x512xf32, #tpu.memory_space<vmem>>, vector<1x32xf32>
    %2 = arith.truncf %0 : vector<16x8xf32> to vector<16x8xbf16>
    %c0_3 = arith.constant 0 : index
    %c0_4 = arith.constant 0 : index
    %3 = vector.load %arg3[%c0_3, %c0_4] : memref<8x32xbf16, #tpu.memory_space<vmem>>, vector<8x32xbf16>
    %cst = arith.constant dense<0.000000e+00> : vector<16x32xf32>
    %4 = tpu.matmul %2, %3, %cst {dimension_numbers = #tpu.dot_dimension_numbers<[1], [0], [0], [1], [0, 0, 1, 1], [], []>} : vector<16x8xbf16>, vector<8x32xbf16>, vector<16x32xf32> -> vector<16x32xf32>
    %5 = vector.broadcast %1 : vector<1x32xf32> to vector<16x32xf32>
    %6 = arith.addf %4, %5 : vector<16x32xf32>
    %cst_5 = arith.constant 0.000000e+00 : f32
    %7 = vector.broadcast %cst_5 : f32 to vector<16x32xf32>
    %8 = arith.maximumf %6, %7 : vector<16x32xf32>
    %c1 = arith.constant 1 : index
    %c0_6 = arith.constant 0 : index
    %9 = vector.load %arg2[%c1, %c0_6] : memref<8x512xf32, #tpu.memory_space<vmem>>, vector<1x64xf32>
    %10 = arith.truncf %8 : vector<16x32xf32> to vector<16x32xbf16>
    %c0_7 = arith.constant 0 : index
    %c0_8 = arith.constant 0 : index
    %11 = vector.load %arg4[%c0_7, %c0_8] : memref<32x64xbf16, #tpu.memory_space<vmem>>, vector<32x64xbf16>
    %cst_9 = arith.constant dense<0.000000e+00> : vector<16x64xf32>
    %12 = tpu.matmul %10, %11, %cst_9 {dimension_numbers = #tpu.dot_dimension_numbers<[1], [0], [0], [1], [0, 0, 1, 1], [], []>} : vector<16x32xbf16>, vector<32x64xbf16>, vector<16x64xf32> -> vector<16x64xf32>
    %13 = vector.broadcast %9 : vector<1x64xf32> to vector<16x64xf32>
    %14 = arith.addf %12, %13 : vector<16x64xf32>
    %cst_10 = arith.constant 0.000000e+00 : f32
    %15 = vector.broadcast %cst_10 : f32 to vector<16x64xf32>
    %16 = arith.maximumf %14, %15 : vector<16x64xf32>
    %c2 = arith.constant 2 : index
    %c0_11 = arith.constant 0 : index
    %17 = vector.load %arg2[%c2, %c0_11] : memref<8x512xf32, #tpu.memory_space<vmem>>, vector<1x128xf32>
    %18 = arith.truncf %16 : vector<16x64xf32> to vector<16x64xbf16>
    %c0_12 = arith.constant 0 : index
    %c0_13 = arith.constant 0 : index
    %19 = vector.load %arg5[%c0_12, %c0_13] : memref<64x128xbf16, #tpu.memory_space<vmem>>, vector<64x128xbf16>
    %cst_14 = arith.constant dense<0.000000e+00> : vector<16x128xf32>
    %20 = tpu.matmul %18, %19, %cst_14 {dimension_numbers = #tpu.dot_dimension_numbers<[1], [0], [0], [1], [0, 0, 1, 1], [], []>} : vector<16x64xbf16>, vector<64x128xbf16>, vector<16x128xf32> -> vector<16x128xf32>
    %21 = vector.broadcast %17 : vector<1x128xf32> to vector<16x128xf32>
    %22 = arith.addf %20, %21 : vector<16x128xf32>
    %cst_15 = arith.constant 0.000000e+00 : f32
    %23 = vector.broadcast %cst_15 : f32 to vector<16x128xf32>
    %24 = arith.maximumf %22, %23 : vector<16x128xf32>
    %c3 = arith.constant 3 : index
    %c0_16 = arith.constant 0 : index
    %25 = vector.load %arg2[%c3, %c0_16] : memref<8x512xf32, #tpu.memory_space<vmem>>, vector<1x512xf32>
    %26 = arith.truncf %24 : vector<16x128xf32> to vector<16x128xbf16>
    %c0_17 = arith.constant 0 : index
    %c0_18 = arith.constant 0 : index
    %27 = vector.load %arg6[%c0_17, %c0_18] : memref<128x512xbf16, #tpu.memory_space<vmem>>, vector<128x512xbf16>
    %cst_19 = arith.constant dense<0.000000e+00> : vector<16x512xf32>
    %28 = tpu.matmul %26, %27, %cst_19 {dimension_numbers = #tpu.dot_dimension_numbers<[1], [0], [0], [1], [0, 0, 1, 1], [], []>} : vector<16x128xbf16>, vector<128x512xbf16>, vector<16x512xf32> -> vector<16x512xf32>
    %29 = vector.broadcast %25 : vector<1x512xf32> to vector<16x512xf32>
    %30 = arith.addf %28, %29 : vector<16x512xf32>
    %cst_20 = arith.constant 0.000000e+00 : f32
    %31 = vector.broadcast %cst_20 : f32 to vector<16x512xf32>
    %32 = arith.maximumf %30, %31 : vector<16x512xf32>
    %c4 = arith.constant 4 : index
    %c0_21 = arith.constant 0 : index
    %33 = vector.load %arg2[%c4, %c0_21] : memref<8x512xf32, #tpu.memory_space<vmem>>, vector<1x128xf32>
    %34 = arith.truncf %32 : vector<16x512xf32> to vector<16x512xbf16>
    %c0_22 = arith.constant 0 : index
    %c0_23 = arith.constant 0 : index
    %35 = vector.load %arg7[%c0_22, %c0_23] : memref<512x128xbf16, #tpu.memory_space<vmem>>, vector<512x128xbf16>
    %cst_24 = arith.constant dense<0.000000e+00> : vector<16x128xf32>
    %36 = tpu.matmul %34, %35, %cst_24 {dimension_numbers = #tpu.dot_dimension_numbers<[1], [0], [0], [1], [0, 0, 1, 1], [], []>} : vector<16x512xbf16>, vector<512x128xbf16>, vector<16x128xf32> -> vector<16x128xf32>
    %37 = vector.broadcast %33 : vector<1x128xf32> to vector<16x128xf32>
    %38 = arith.addf %36, %37 : vector<16x128xf32>
    %cst_25 = arith.constant 0.000000e+00 : f32
    %39 = vector.broadcast %cst_25 : f32 to vector<16x128xf32>
    %40 = arith.maximumf %38, %39 : vector<16x128xf32>
    %c5 = arith.constant 5 : index
    %c0_26 = arith.constant 0 : index
    %41 = vector.load %arg2[%c5, %c0_26] : memref<8x512xf32, #tpu.memory_space<vmem>>, vector<1x64xf32>
    %42 = arith.truncf %40 : vector<16x128xf32> to vector<16x128xbf16>
    %c0_27 = arith.constant 0 : index
    %c0_28 = arith.constant 0 : index
    %43 = vector.load %arg8[%c0_27, %c0_28] : memref<128x64xbf16, #tpu.memory_space<vmem>>, vector<128x64xbf16>
    %cst_29 = arith.constant dense<0.000000e+00> : vector<16x64xf32>
    %44 = tpu.matmul %42, %43, %cst_29 {dimension_numbers = #tpu.dot_dimension_numbers<[1], [0], [0], [1], [0, 0, 1, 1], [], []>} : vector<16x128xbf16>, vector<128x64xbf16>, vector<16x64xf32> -> vector<16x64xf32>
    %45 = vector.broadcast %41 : vector<1x64xf32> to vector<16x64xf32>
    %46 = arith.addf %44, %45 : vector<16x64xf32>
    %cst_30 = arith.constant 0.000000e+00 : f32
    %47 = vector.broadcast %cst_30 : f32 to vector<16x64xf32>
    %48 = arith.maximumf %46, %47 : vector<16x64xf32>
    %c6 = arith.constant 6 : index
    %c0_31 = arith.constant 0 : index
    %49 = vector.load %arg2[%c6, %c0_31] : memref<8x512xf32, #tpu.memory_space<vmem>>, vector<1x128xf32>
    %50 = arith.truncf %48 : vector<16x64xf32> to vector<16x64xbf16>
    %c0_32 = arith.constant 0 : index
    %c0_33 = arith.constant 0 : index
    %51 = vector.load %arg9[%c0_32, %c0_33] : memref<64x128xbf16, #tpu.memory_space<vmem>>, vector<64x128xbf16>
    %cst_34 = arith.constant dense<0.000000e+00> : vector<16x128xf32>
    %52 = tpu.matmul %50, %51, %cst_34 {dimension_numbers = #tpu.dot_dimension_numbers<[1], [0], [0], [1], [0, 0, 1, 1], [], []>} : vector<16x64xbf16>, vector<64x128xbf16>, vector<16x128xf32> -> vector<16x128xf32>
    %53 = vector.broadcast %49 : vector<1x128xf32> to vector<16x128xf32>
    %54 = arith.addf %52, %53 : vector<16x128xf32>
    %cst_35 = arith.constant dense<0xFF800000> : vector<16xf32>
    %55 = vector.multi_reduction <maximumf>, %54, %cst_35 [1] : vector<16x128xf32> to vector<16xf32>
    %56 = vector.shape_cast %55 : vector<16xf32> to vector<16x1xf32>
    %57 = vector.broadcast %56 : vector<16x1xf32> to vector<16x128xf32>
    %58 = arith.subf %54, %57 : vector<16x128xf32>
    %59 = math.exp %58 : vector<16x128xf32>
    %cst_36 = arith.constant dense<0.000000e+00> : vector<16xf32>
    %60 = vector.multi_reduction <add>, %59, %cst_36 [1] : vector<16x128xf32> to vector<16xf32>
    %61 = vector.shape_cast %60 : vector<16xf32> to vector<16x1xf32>
    %62 = tpu.reciprocal %61 : vector<16x1xf32> -> vector<16x1xf32>
    %63 = vector.broadcast %62 : vector<16x1xf32> to vector<16x128xf32>
    %64 = arith.mulf %59, %63 : vector<16x128xf32>
    %c0_37 = arith.constant 0 : index
    %c0_38 = arith.constant 0 : index
    %65 = vector.load %arg10[%c0_37, %c0_38] : memref<16x128xf32, #tpu.memory_space<vmem>>, vector<16x128xf32>
    tpu.vector_store %arg10[%c0_37, %c0_38], %64 {strides = array<i32>} : memref<16x128xf32, #tpu.memory_space<vmem>>, vector<16x128xf32>,
    return
  }
  func.func @transform_0(%arg0: i32) -> (i32, i32) {
    %c0_i32 = arith.constant 0 : i32
    %c0_i32_0 = arith.constant 0 : i32
    return %arg0, %c0_i32 : i32, i32
  }
  func.func @transform_1(%arg0: i32) -> (i32, i32) {
    %c0_i32 = arith.constant 0 : i32
    %c0_i32_0 = arith.constant 0 : i32
    %c0_i32_1 = arith.constant 0 : i32
    return %c0_i32, %c0_i32_0 : i32, i32
  }
  func.func @transform_2(%arg0: i32) -> (i32, i32) {
    %c0_i32 = arith.constant 0 : i32
    %c0_i32_0 = arith.constant 0 : i32
    %c0_i32_1 = arith.constant 0 : i32
    return %c0_i32, %c0_i32_0 : i32, i32
  }
  func.func @transform_3(%arg0: i32) -> (i32, i32) {
    %c0_i32 = arith.constant 0 : i32
    %c0_i32_0 = arith.constant 0 : i32
    %c0_i32_1 = arith.constant 0 : i32
    return %c0_i32, %c0_i32_0 : i32, i32
  }
  func.func @transform_4(%arg0: i32) -> (i32, i32) {
    %c0_i32 = arith.constant 0 : i32
    %c0_i32_0 = arith.constant 0 : i32
    %c0_i32_1 = arith.constant 0 : i32
    return %c0_i32, %c0_i32_0 : i32, i32
  }
  func.func @transform_5(%arg0: i32) -> (i32, i32) {
    %c0_i32 = arith.constant 0 : i32
    %c0_i32_0 = arith.constant 0 : i32
    %c0_i32_1 = arith.constant 0 : i32
    return %c0_i32, %c0_i32_0 : i32, i32
  }
  func.func @transform_6(%arg0: i32) -> (i32, i32) {
    %c0_i32 = arith.constant 0 : i32
    %c0_i32_0 = arith.constant 0 : i32
    %c0_i32_1 = arith.constant 0 : i32
    return %c0_i32, %c0_i32_0 : i32, i32
  }
  func.func @transform_7(%arg0: i32) -> (i32, i32) {
    %c0_i32 = arith.constant 0 : i32
    %c0_i32_0 = arith.constant 0 : i32
    %c0_i32_1 = arith.constant 0 : i32
    return %c0_i32, %c0_i32_0 : i32, i32
  }
  func.func @transform_8(%arg0: i32) -> (i32, i32) {
    %c0_i32 = arith.constant 0 : i32
    %c0_i32_0 = arith.constant 0 : i32
    %c0_i32_1 = arith.constant 0 : i32
    return %c0_i32, %c0_i32_0 : i32, i32
  }
  func.func @transform_9(%arg0: i32) -> (i32, i32) {
    %c0_i32 = arith.constant 0 : i32
    %c0_i32_0 = arith.constant 0 : i32
    return %arg0, %c0_i32 : i32, i32
  }
}

</mosaic_0001>

<bundles_post_ra>
// kernel: tpu_custom_call.1
= control target key start
LH: loop header
LB: loop body
LE: loop exit
PB: predicated region body
PF: predicated region fallthrough
CT: control target
= control target key end

     0   :  { %14 = vsyncpa [#allocation3], 0  ;;  %s2405_s0 = inlined_call_operand.vmem [shape: f32[32,8], index: 0, kind: input, shape index: {}]   ;;  %s2406_s1 = inlined_call_operand.vmem [shape: f32[8,512], index: 1, kind: input, shape index: {}]   ;;  %s2407_s2 = inlined_call_operand.vmem [shape: bf16[8,32], index: 2, kind: input, shape index: {}]   ;;  %s2408_s3 = inlined_call_operand.vmem [shape: bf16[32,64], index: 3, kind: input, shape index: {}]   ;;  %s2409_s4 = inlined_call_operand.vmem [shape: bf16[64,128], index: 4, kind: input, shape index: {}]   ;;  %s2410_s5 = inlined_call_operand.hbm [shape: bf16[128,512], index: 5, kind: input, shape index: {}]   ;;  %s2411_s6 = inlined_call_operand.hbm [shape: bf16[512,128], index: 6, kind: input, shape index: {}]   ;;  %s2412_s7 = inlined_call_operand.vmem [shape: bf16[128,64], index: 7, kind: input, shape index: {}]   ;;  %s2413_s8 = inlined_call_operand.vmem [shape: bf16[64,128], index: 8, kind: input, shape index: {}]   ;;  %s2414_s9 = inlined_call_operand.hbm [shape: f32[32,128], index: 9, kind: output, shape index: {}]  }
   0x1   :  { %15 = vsyncpa [#allocation6], 0 }
   0x2   :  { %16 = vsyncpa [#allocation4], 0 }
   0x3   :  { %18 = vsyncpa [#allocation4 + $0x1], 0  ;;  %s2122_s30 = smov 0   ;;  %s2124_s10 = smov 0  }
   0x4   :  { %s2126_s11 = smov 0   ;;  %s2128_s12 = smov 0  }
   0x5 LB: > { %2421 = sst [smem:[#allocation11_spill]] %s2054_s11  ;;  %s2143_s13 = sadd.s32 4294967295, %s2058_s12   ;;  %s2058_s12 = sphi %s2128_s12, %s2435_s12   ;;  %s2054_s11 = sphi %s2126_s11, %s2437_s11   ;;  %s2050_s10 = sphi %s2124_s10, %s2439_s10   ;;  %s2046_s30 = sphi %s2122_s30, %s2438_s30  }
   0x6   : > { %s1527_s14 = sadd.s32 4294967294, %s2058_s12   ;;  %s2147_s15 = sadd.s32 1, %s2058_s12  }
   0x7   : > { %2422 = sst [smem:[#allocation12_spill]] %s2147_s15  ;;  %s225_s16 = sadd.s32 1, %s2054_s11 }
   0x8   : > { %s222_s17 = ssub.s32 %s2058_s12, %s2147_s15  ;;  %p235_p0 = scmp.ne.s32.totalorder %s2054_s11, %s2050_s10 }
   0x9   : > { %p223_p1 = scmp.eq.s32.totalorder %s222_s17, 0  ;;  %p236_p2 = scmp.eq.s32.totalorder %s2143_s13, 1 }
   0xa   : > { %p241_p3 = scmp.ne.s32.totalorder %s2050_s10, %s2046_s30  ;;  %p242_p4 = scmp.eq.s32.totalorder %s1527_s14, 1 }
   0xb   : > { %s2158_s18 = scalar_select %p223_p1, %s2054_s11, %s225_s16  }
   0xc   : > { %p2160_p5 = por %p236_p2, %p235_p0  ;;  %p2164_p6 = por %p242_p4, %p241_p3 }
   0xd   : > { %2423 = sst [smem:[#allocation13_spill]] %s2158_s18  ;;  %p1528_p7 = scmp.ge.s32.totalorder %s2058_s12, 1 }
   0xe   : > { %s2424_s19 = scalar_select %p2160_p5, 1, 0 }
   0xf   : > { %s2425_s20 = scalar_select %p2164_p6, 1, 0 }
  0x10   : > { %p249_p8 = scmp.lt.s32.totalorder %s2058_s12, 3  ;;  %p2415_p9 = scmp.eq.s32.totalorder %s2143_s13, 0 }
  0x11   : > { %s2060_s22 = smov [#allocation2]   ;;  %s2061_s25 = smov [#allocation5]  }
  0x12   : > { %p2171_p10 = pnand %p1528_p7, %p249_p8  ;;  %s273_s23 = sshll.u32 %s2060_s22, 4  ;;  %s274_s23 = int_to_ptr.vmem [resolvable:$true] %s273_s23 }
  0x13   : > { %s286_s26 = sshll.u32 %s2061_s25, 4  ;;  %s1932_s29 = scalar_lea.hbm %s2410_s5, 4096  ;;  %s2183_s26 = int_to_ptr.vmem [resolvable:$true] %s286_s26 }
  0x14   : > { %s2426_s21 = scalar_select %p2171_p10, 1, 0 }
  0x15   : > { %p1767_p11 = pneg %p2171_p10  ;;  %p1933_p13 = scmp.ne.s32.totalorder %s2410_s5, %s1932_s29 }
  0x16   : > { %p1939_p3 = scmp.lt.u32.totalorder %s1932_s29, %s2410_s5 }
  0x17   : > { %p2179_p12 = pnand %p2415_p9, %p1767_p11 }
  0x19   : > { %p1934_p0 = pneg %p2179_p12 }
  0x1b   : > { %p1935_p1 = pnand %p1934_p0, %p1933_p13 }
  0x1d   : > { %p1936_p2 = pneg %p1935_p1 }
  0x1f   : > { %p1941_p4 = pnand %p1939_p3, %p1936_p2 }
  0x21   : > { %1944 = shalt.err (!%p1941_p4)
}
  0x22   : > { %s1945_s25 = scalar_lea.vmem %s274_s23, 4096  ;;  %p1953_p9 = scmp.lt.s32.totalorder %s274_s23, %s274_s23 }
  0x23   : > { %p1946_p7 = scmp.ne.s32.totalorder %s274_s23, %s1945_s25  ;;  %p1954_p6 = scmp.lt.s32.totalorder %s1945_s25, %s1945_s25 }
  0x25   : > { %p1948_p8 = pnand %p1946_p7, %p1934_p0  ;;  %p1955_p5 = por %p1954_p6, %p1953_p9 }
  0x27   : > { %p1949_p11 = pneg %p1948_p8 }
  0x29   : > { %p1956_p10 = pnand %p1955_p5, %p1949_p11 }
  0x2b   : > { %1959 = shalt.err (!%p1956_p10)
}
  0x2c   : > { %s2062_s27 = smov 256   ;;  %s2063_s28 = smov 16  }
  0x2d   : > { %1770 = dma.hbm_to_vmem [thread:$0]  (!%p2179_p12), %s2410_s5, 4096, %s274_s23, [#allocation3], %s2062_s27, %s2062_s27, %s2063_s28  }
  0x2e   : > { %s1960_s22 = scalar_lea.hbm %s2411_s6, 4096 }
  0x2f   : > { %p1961_p13 = scmp.ne.s32.totalorder %s2411_s6, %s1960_s22  ;;  %p1967_p9 = scmp.lt.u32.totalorder %s1960_s22, %s2411_s6 }
  0x31   : > { %p1963_p5 = pnand %p1961_p13, %p1934_p0 }
  0x33   : > { %p1964_p6 = pneg %p1963_p5 }
  0x35   : > { %p1969_p10 = pnand %p1967_p9, %p1964_p6 }
  0x37   : > { %1972 = shalt.err (!%p1969_p10)
}
  0x38   : > { %s1973_s23 = scalar_lea.vmem %s2183_s26, 4096  ;;  %p1981_p4 = scmp.lt.s32.totalorder %s2183_s26, %s2183_s26 }
  0x39   : > { %p1974_p1 = scmp.ne.s32.totalorder %s2183_s26, %s1973_s23  ;;  %p1982_p7 = scmp.lt.s32.totalorder %s1973_s23, %s1973_s23 }
  0x3b   : > { %p1976_p2 = pnand %p1974_p1, %p1934_p0  ;;  %p1983_p8 = por %p1982_p7, %p1981_p4 }
  0x3d   : > { %p1977_p3 = pneg %p1976_p2 }
  0x3f   : > { %p1984_p11 = pnand %p1983_p8, %p1977_p3 }
  0x41   : > { %1987 = shalt.err (!%p1984_p11)
}
  0x42   : > { %s2064_s11 = smov 64   ;;  %s2065_s15 = smov 4  }
  0x43   : > { %1773 = dma.hbm_to_vmem [thread:$0]  (!%p2179_p12), %s2411_s6, 4096, %s2183_s26, [#allocation6], %s2064_s11, %s2064_s11, %s2065_s15  }
  0x44   : > { %p2428_p13 = scmp.ne.s32.totalorder %s2426_s21, 0 }
  0x45   : > { %p2429_p0 = scmp.eq.s32.totalorder (!%p2428_p13), %s2143_s13, 0 }
  0x46   : > { %317 = sbr.rel (%p2428_p13) target bundleno = 1962 (0x7aa), region = 56 }
  0x4d   : > { %2033 = dma.done.wait (%p2429_p0), [#allocation3], 4096   ;;  %p2430_p5 = pmov %p2429_p0 }
  0x4e   : > { %p2431_p6 = pmov %p2429_p0 }
  0x4f   : > { %2035 = vsyncadd (%p2430_p5), [#allocation3], 4294963200 }
  0x50   : > { %2037 = dma.done.wait (%p2431_p6), [#allocation6], 4096   ;;  %p2432_p9 = pmov %p2429_p0 }
  0x51   : > { %s1536_s24 = sshll.u32 %s2143_s13, 1  ;;  %v2066_v0 = vmov 0.0   ;;  %vm2067_vm0 = vmmov 0   ;;  %vm374_vm1 = vcmask 1043456   ;;  %v369_v1 = vld [vmem:[%s2407_s2] sm:$0xf] }
  0x52   : > { %2039 = vsyncadd (%p2432_p9), [#allocation6], 4294963200  ;;  %1699 = vmatprep.subr.bf16.mxu0 %v2066_v0  ;;  %1701 = vmatprep.mubr.msk.bf16.mxu0 %vm2067_vm0, %v2066_v0  ;;  %p358_p12 = scmp.lt.s32.totalorder %s1536_s24, 3  ;;  %v376_v4 = vsel %vm374_vm1, %v369_v1, 0  ;;  %vm370_vm2 = vcmask 64512   ;;  %v1826_v6 = vld [vmem:[%s2408_s3] sm:$0xff]  }
  0x53   : > { %1705 = vmatprep.subr.bf16.mxu1 %v2066_v0  ;;  %1709 = vmatprep.mubr.msk.bf16.mxu1 %vm2067_vm0, %v2066_v0  ;;  %v1827_v7 = vld [vmem:[%s2408_s3 + $0x8] sm:$0xff]   ;;  %v1828_v8 = vld [vmem:[%s2409_s4] sm:$0xff]   ;;  %vm439_vm3 = vcmask 261120   ;;  %v1830_v20 = vld [vmem:[%s2409_s4 + $0x10] sm:$0xff]   ;;  %vm520_vm4 = vcmask 523264   ;;  %v2068_v1 = vmov 0  }
  0x54   : > { %s2441_s24 = smov (!%p358_p12, %s1536_s24), 3  ;;  %1700 = vmatpush3.bf16.msra.mxu0 %v376_v4  ;;  %1706 = vmatpush3.bf16.msra.mxu1 %v1826_v6  ;;  %v1829_v9 = vld [vmem:[%s2409_s4 + $0x8] sm:$0xff]   ;;  %v367_v10 = vld [vmem:[%s2406_s1] ss:$0 sm:$0xff]  ;;  %v1831_v21 = vld [vmem:[%s2409_s4 + $0x18] sm:$0xff]   ;;  %s354_s15 = sand.u32 1, %s2050_s10  }
  0x55   : > { %s1537_s21 = sshll.u32 %s2441_s24, 3  ;;  %1713 = vmatprep.subr.bf16.mxu0 %v2066_v0  ;;  %1707 = vmatprep.subr.bf16.mxu1 %v2066_v0  ;;  %v1832_v22 = vld [vmem:[#allocation2] ss:$16 sps:$4 sm:$0xff]   ;;  %v1834_v23 = vld [vmem:[#allocation2 + $0x4] ss:$16 sps:$4 sm:$0xff]   ;;  %s1535_s18 = sshll.u32 %s354_s15, 4 }
  0x56   : > { %s361_s29 = scalar_lea.vmem %s2405_s0, %s1537_s21  ;;  %v1837_v24 = vld [vmem:[#allocation2 + $0xc] ss:$16 sps:$4 sm:$0xff]   ;;  %v1840_v25 = vld [vmem:[#allocation2 + $0x24] ss:$16 sps:$4 sm:$0xff]   ;;  %v1838_v26 = vld [vmem:[#allocation2 + $0x20] ss:$16 sps:$4 sm:$0xff]  }
  0x57   : > { %v365_v2 = vld [vmem:[%s361_s29] sm:$0xff]  ;;  %v366_v3 = vld [vmem:[%s361_s29 + $0x8] sm:$0xff]  ;;  %s1630_s27 = sshll.u32 %s2143_s13, 8  ;;  %s356_s24 = scalar_lea.vmem [#allocation7], %s1535_s18 }
  0x58   : > { %v368_v5 = vpack.c.bf16 %v366_v3, %v365_v2  ;;  %1708 = vmatpush3.bf16.msra.mxu1 %v1827_v7  ;;  %v1846_v27 = vld [vmem:[#allocation2 + $0x44] ss:$16 sps:$4 sm:$0xff]   ;;  %v1844_v28 = vld [vmem:[#allocation2 + $0x40] ss:$16 sps:$4 sm:$0xff]   ;;  %v1835_v44 = vld [vmem:[#allocation2 + $0x8] ss:$16 sps:$4 sm:$0xff]   ;;  %s2360_s29 = scalar_lea.hbm %s2414_s9, %s1630_s27 }
  0x59   : > { %783 = vmatprep.subr.bf16.mxu1 %v1834_v23  ;;  %v1852_v29 = vld [vmem:[#allocation2 + $0x64] ss:$16 sps:$4 sm:$0xff]   ;;  %v1850_v30 = vld [vmem:[#allocation2 + $0x60] ss:$16 sps:$4 sm:$0xff]   ;;  %v1843_v46 = vld [vmem:[#allocation2 + $0x2c] ss:$16 sps:$4 sm:$0xff]  }
  0x5a   : > { %1702 = vmatmul.mubr.msk.bf16.vlgmr.msra.gmra.mrb[0].mxu0 %vm370_vm2, %v368_v5  ;;  %v1858_v31 = vld [vmem:[#allocation2 + $0x84] ss:$16 sps:$4 sm:$0xff]   ;;  %v1856_v32 = vld [vmem:[#allocation2 + $0x80] ss:$16 sps:$4 sm:$0xff]   ;;  %v1841_v47 = vld [vmem:[#allocation2 + $0x28] ss:$16 sps:$4 sm:$0xff]  }
  0x5b   : > { %1721 = vmatprep.mubr.msk.bf16.mxu0 %vm2067_vm0, %v2066_v0  ;;  %1714 = vmatpush3.bf16.msra.mxu0 %v1828_v8  ;;  %v1864_v33 = vld [vmem:[#allocation2 + $0xa4] ss:$16 sps:$4 sm:$0xff]   ;;  %v1862_v34 = vld [vmem:[#allocation2 + $0xa0] ss:$16 sps:$4 sm:$0xff]   ;;  %v1849_v48 = vld [vmem:[#allocation2 + $0x4c] ss:$16 sps:$4 sm:$0xff]  }
  0x5c   : > { %1715 = vmatprep.subr.bf16.mxu0 %v2066_v0  ;;  %v421_v35 = vld [vmem:[%s2406_s1 + $0x1] ss:$0 sm:$0xff]  ;;  %v1847_v49 = vld [vmem:[#allocation2 + $0x48] ss:$16 sps:$4 sm:$0xff]   ;;  %v1855_v50 = vld [vmem:[#allocation2 + $0x6c] ss:$16 sps:$4 sm:$0xff]  }
  0x5d   : > { %v1853_v51 = vld [vmem:[#allocation2 + $0x68] ss:$16 sps:$4 sm:$0xff]   ;;  %v1861_v52 = vld [vmem:[#allocation2 + $0x8c] ss:$16 sps:$4 sm:$0xff]   ;;  %v1870_v56 = vld [vmem:[#allocation2 + $0xc4] ss:$16 sps:$4 sm:$0xff]  }
  0x5e   : > { %v1859_v53 = vld [vmem:[#allocation2 + $0x88] ss:$16 sps:$4 sm:$0xff]   ;;  %v1867_v54 = vld [vmem:[#allocation2 + $0xac] ss:$16 sps:$4 sm:$0xff]   ;;  %v1868_v58 = vld [vmem:[#allocation2 + $0xc0] ss:$16 sps:$4 sm:$0xff]  }
  0x5f   : > { %1716 = vmatpush3.bf16.msra.mxu0 %v1829_v9  ;;  %v1865_v55 = vld [vmem:[#allocation2 + $0xa8] ss:$16 sps:$4 sm:$0xff]   ;;  %v1873_v57 = vld [vmem:[#allocation2 + $0xcc] ss:$16 sps:$4 sm:$0xff]   ;;  %v1876_v60 = vld [vmem:[#allocation2 + $0xe4] ss:$16 sps:$4 sm:$0xff]  }
  0x60   : > { %1717 = vmatprep.subr.bf16.mxu0 %v2066_v0  ;;  %v1871_v59 = vld [vmem:[#allocation2 + $0xc8] ss:$16 sps:$4 sm:$0xff]   ;;  %v1879_v61 = vld [vmem:[#allocation2 + $0xec] ss:$16 sps:$4 sm:$0xff]   ;;  %v1874_v62 = vld [vmem:[#allocation2 + $0xe0] ss:$16 sps:$4 sm:$0xff]  }
  0x61   : > { %v1877_v63 = vld [vmem:[#allocation2 + $0xe8] ss:$16 sps:$4 sm:$0xff]   ;;  %v1880_v2 = vld [vmem:[#allocation5 + $0x40] sm:$0xff]   ;;  %v1891_v23 = vld [vmem:[#allocation5 + $0x90] sm:$0xff]   ;;  %s1443_s21 = sshll.u32 %s356_s24, 4  ;;  %s2364_s14 = scalar_lea.sflag [#allocation4], %s354_s15  ;;  %s2362_s21 = int_to_ptr.vmem [resolvable:$true] %s1443_s21 }
  0x62   : > { %v1881_v3 = vld [vmem:[#allocation5 + $0xc0] sm:$0xff]   ;;  %s1988_s16 = scalar_lea.vmem %s2362_s21, 256  ;;  %p2433_p1 = scmp.ne.s32.totalorder %s2424_s19, 0 }
  0x63   : > { %1718 = vmatpush3.bf16.msra.mxu0 %v1830_v20  ;;  %v486_v4 = vld [vmem:[%s2406_s1 + $0x2] ss:$0 sm:$0xff]  ;;  %v1888_v20 = vld [vmem:[#allocation5 + $0x50] sm:$0xff]   ;;  %p1989_p10 = scmp.ne.s32.totalorder %s2362_s21, %s1988_s16  ;;  %s2069_s13 = smov [#allocation7]  }
  0x64   : > { %1719 = vmatprep.subr.bf16.mxu0 %v2066_v0  ;;  %s1992_s17 = sshll.u32 %s2069_s13, 4  ;;  %s1993_s17 = int_to_ptr.vmem [resolvable:$false] %s1992_s17 }
  0x65   : > { %p1990_p2 = pnand %p1989_p10, %p2433_p1  ;;  %s1994_s22 = scalar_lea.vmem %s1993_s17, 512 }
  0x66   : > { %p1995_p4 = scmp.lt.s32.totalorder %s2362_s21, %s1993_s17  ;;  %p1996_p7 = scmp.lt.s32.totalorder %s1994_s22, %s1988_s16 }
  0x67   : > { %1720 = vmatpush3.bf16.msra.mxu0 %v1831_v21  ;;  %v1889_v21 = vld [vmem:[#allocation5 + $0xd0] sm:$0xff]   ;;  %p1991_p3 = pneg %p1990_p2 }
  0x68   : > { %826 = vmatprep.subr.bf16.mxu0 %v1837_v24  ;;  %v1892_v24 = vld [vmem:[#allocation5 + $0x58] sm:$0xff]   ;;  %p1997_p8 = por %p1996_p7, %p1995_p4 }
  0x6a   : > { %p1998_p11 = pnand %p1997_p8, %p1991_p3 }
 0x12d   : > { %v412_v11 = vpop.f32.mrb[0].mxu0 }
 0x12e   : > { %v413_v12 = vadd.f32 %v412_v11, %v367_v10  ;;  %v1703_v13 = vpop.f32.mrb[1].mxu0 }
 0x12f   : > { %v415_v14 = vpop.f32.mrb[2].mxu0  ;;  %v1882_v13 = vld [vmem:[#allocation5] sm:$0xff]  }
 0x130   : > { %v416_v15 = vadd.f32 %v415_v14, %v367_v10  ;;  %v1704_v16 = vpop.f32.mrb[3].mxu0  ;;  %v419_v17 = vmax.f32 %v413_v12, 0.0  ;;  %v1883_v14 = vld [vmem:[#allocation5 + $0x80] sm:$0xff]  }
 0x131   : > { %v1884_v16 = vld [vmem:[#allocation5 + $0x48] sm:$0xff]  }
 0x132   : > { %v420_v18 = vmax.f32 %v416_v15, 0.0 }
 0x134   : > { %v422_v19 = vpack.c.bf16 %v420_v18, %v419_v17  ;;  %v1885_v17 = vld [vmem:[#allocation5 + $0xc8] sm:$0xff]  }
 0x135   : > { %v1886_v18 = vld [vmem:[#allocation5 + $0x8] sm:$0xff]  }
 0x136   : > { %1710 = vmatmul.mubr.msk.bf16.vlgmr.msra.gmra.mrb[0].mxu1 %vm439_vm3, %v422_v19  ;;  %v1887_v19 = vld [vmem:[#allocation5 + $0x88] sm:$0xff]  }
 0x137   : > { %784 = vmatpush1.bf16.msra.mxu1 %v1832_v22  ;;  %815 = vmatprep.mubr.bf16.mxu1 %v2068_v1  ;;  %v1890_v22 = vld [vmem:[#allocation5 + $0x10] sm:$0xff]  }
 0x138   : > { %785 = vmatprep.subr.bf16.mxu1 %v1840_v25  ;;  %v1893_v25 = vld [vmem:[#allocation5 + $0xd8] sm:$0xff]  }
 0x13b   : > { %786 = vmatpush1.bf16.msra.mxu1 %v1838_v26  ;;  %v1894_v26 = vld [vmem:[#allocation5 + $0x18] sm:$0xff]  }
 0x13c   : > { %787 = vmatprep.subr.bf16.mxu1 %v1846_v27  ;;  %v1895_v27 = vld [vmem:[#allocation5 + $0x98] sm:$0xff]  }
 0x13f   : > { %788 = vmatpush1.bf16.msra.mxu1 %v1844_v28  ;;  %v1896_v28 = vld [vmem:[#allocation5 + $0x60] sm:$0xff]  }
 0x140   : > { %789 = vmatprep.subr.bf16.mxu1 %v1852_v29  ;;  %v1897_v29 = vld [vmem:[#allocation5 + $0xe0] sm:$0xff]  }
 0x143   : > { %790 = vmatpush1.bf16.msra.mxu1 %v1850_v30  ;;  %v1898_v30 = vld [vmem:[#allocation5 + $0x20] sm:$0xff]  }
 0x144   : > { %791 = vmatprep.subr.bf16.mxu1 %v1858_v31  ;;  %v1899_v31 = vld [vmem:[#allocation5 + $0xa0] sm:$0xff]  }
 0x147   : > { %792 = vmatpush1.bf16.msra.mxu1 %v1856_v32  ;;  %v1900_v32 = vld [vmem:[#allocation5 + $0x68] sm:$0xff]  }
 0x148   : > { %793 = vmatprep.subr.bf16.mxu1 %v1864_v33  ;;  %v1901_v33 = vld [vmem:[#allocation5 + $0xe8] sm:$0xff]  }
 0x14b   : > { %794 = vmatpush1.bf16.msra.mxu1 %v1862_v34  ;;  %v1902_v34 = vld [vmem:[#allocation5 + $0x28] sm:$0xff]  }
 0x14c   : > { %795 = vmatprep.subr.bf16.mxu1 %v1870_v56 }
 0x14f   : > { %796 = vmatpush1.bf16.msra.mxu1 %v1868_v58 }
 0x150   : > { %797 = vmatprep.subr.bf16.mxu1 %v1876_v60 }
 0x153   : > { %798 = vmatpush1.bf16.msra.mxu1 %v1874_v62 }
 0x154   : > { %1641 = vmatprep.subr.bf16.mxu1 %v1880_v2 }
 0x209   : > { %v477_v36 = vpop.f32.mrb[0].mxu1 }
 0x20a   : > { %v478_v37 = vadd.f32 %v477_v36, %v421_v35  ;;  %v1711_v38 = vpop.f32.mrb[1].mxu1  ;;  %v1904_v36 = vld [vmem:[#allocation5 + $0x70] sm:$0xff]  }
 0x20b   : > { %v480_v39 = vpop.f32.mrb[2].mxu1  ;;  %v1906_v38 = vld [vmem:[#allocation5 + $0x30] sm:$0xff]  }
 0x20c   : > { %v481_v40 = vadd.f32 %v480_v39, %v421_v35  ;;  %v1712_v41 = vpop.f32.mrb[3].mxu1  ;;  %v484_v42 = vmax.f32 %v478_v37, 0.0  ;;  %v1903_v35 = vld [vmem:[#allocation5 + $0xa8] sm:$0xff]   ;;  %v1905_v37 = vld [vmem:[#allocation5 + $0xf0] sm:$0xff]  }
 0x20d   : > { %v1907_v39 = vld [vmem:[#allocation5 + $0xb0] sm:$0xff]   ;;  %v1909_v41 = vld [vmem:[#allocation5 + $0xf8] sm:$0xff]  }
 0x20e   : > { %v485_v43 = vmax.f32 %v481_v40, 0.0  ;;  %v1908_v40 = vld [vmem:[#allocation5 + $0x78] sm:$0xff]  }
 0x210   : > { %v487_v45 = vpack.c.bf16 %v485_v43, %v484_v42  ;;  %v1910_v42 = vld [vmem:[#allocation5 + $0x38] sm:$0xff]  }
 0x211   : > { %v1911_v43 = vld [vmem:[#allocation5 + $0xb8] sm:$0xff]  }
 0x212   : > { %1722 = vmatmul.mubr.msk.bf16.vlgmr.msra.gmra.mrb[4].mxu0 %vm520_vm4, %v487_v45 }
 0x213   : > { %827 = vmatpush1.bf16.msra.mxu0 %v1835_v44  ;;  %858 = vmatprep.mubr.bf16.mxu0 %v2068_v1  ;;  %v603_v44 = vlaneseq }
 0x214   : > { %828 = vmatprep.subr.bf16.mxu0 %v1843_v46 }
 0x215   : > { %v604_v45 = vshrl.u32 %v603_v44, 7 }
 0x217   : > { %829 = vmatpush1.bf16.msra.mxu0 %v1841_v47  ;;  %v605_v46 = vsub.s32 0, %v604_v45  ;;  %v613_v47 = vsub.s32 2, %v604_v45 }
 0x218   : > { %830 = vmatprep.subr.bf16.mxu0 %v1849_v48  ;;  %v1547_v48 = vld [vmem:[%s2406_s1 + $0x3] ss:$8 sm:$0xf] }
 0x21b   : > { %831 = vmatpush1.bf16.msra.mxu0 %v1847_v49  ;;  %v609_v49 = vsub.s32 1, %v604_v45 }
 0x21c   : > { %832 = vmatprep.subr.bf16.mxu0 %v1855_v50  ;;  %v617_v50 = vsub.s32 3, %v604_v45 }
 0x21f   : > { %833 = vmatpush1.bf16.msra.mxu0 %v1853_v51  ;;  %v606_v51 = vrot.slane %v1547_v48, %v605_v46 }
 0x220   : > { %834 = vmatprep.subr.bf16.mxu0 %v1861_v52  ;;  %v614_v52 = vrot.slane %v1547_v48, %v613_v47 }
 0x223   : > { %835 = vmatpush1.bf16.msra.mxu0 %v1859_v53  ;;  %v610_v53 = vrot.slane %v1547_v48, %v609_v49 }
 0x224   : > { %836 = vmatprep.subr.bf16.mxu0 %v1867_v54  ;;  %v618_v54 = vrot.slane %v1547_v48, %v617_v50  ;;  %v1922_v50 = vld [vmem:[%s2413_s8 + $0x10] sm:$0xff]  }
 0x227   : > { %837 = vmatpush1.bf16.msra.mxu0 %v1865_v55 }
 0x228   : > { %838 = vmatprep.subr.bf16.mxu0 %v1873_v57 }
 0x22b   : > { %839 = vmatpush1.bf16.msra.mxu0 %v1871_v59 }
 0x22c   : > { %840 = vmatprep.subr.bf16.mxu0 %v1879_v61 }
 0x22f   : > { %841 = vmatpush1.bf16.msra.mxu0 %v1877_v63 }
 0x230   : > { %1663 = vmatprep.subr.bf16.mxu0 %v1881_v3 }
 0x2e5   : > { %v558_v5 = vpop.f32.mrb[4].mxu0 }
 0x2e6   : > { %v559_v6 = vadd.f32 %v558_v5, %v486_v4  ;;  %v1723_v7 = vpop.f32.mrb[5].mxu0 }
 0x2e7   : > { %v561_v8 = vpop.f32.mrb[6].mxu0 }
 0x2e8   : > { %v562_v9 = vadd.f32 %v561_v8, %v486_v4  ;;  %v1724_v10 = vpop.f32.mrb[7].mxu0  ;;  %v565_v11 = vmax.f32 %v559_v6, 0.0 }
 0x2ea   : > { %v566_v12 = vmax.f32 %v562_v9, 0.0 }
 0x2ec   : > { %v569_v15 = vpack.c.bf16 %v566_v12, %v565_v11 }
 0x2ee   : > { %816 = vmatmul.mubr.bf16.vlgmr.msra.gmra.mrb[4].mxu1 %v569_v15  ;;  %859 = vmatmul.mubr.bf16.vlgmr.msra.gmra.mrb[8].mxu0 %v569_v15 }
 0x2ef   : > { %1642 = vmatpush3.bf16.msra.mxu1 %v1882_v13  ;;  %1664 = vmatpush3.bf16.msra.mxu0 %v1883_v14 }
 0x2f0   : > { %1643 = vmatprep.subr.bf16.mxu1 %v1884_v16  ;;  %1665 = vmatprep.subr.bf16.mxu0 %v1885_v17 }
 0x2f3   : > { %1644 = vmatpush3.bf16.msra.mxu1 %v1886_v18  ;;  %1666 = vmatpush3.bf16.msra.mxu0 %v1887_v19 }
 0x2f4   : > { %1645 = vmatprep.subr.bf16.mxu1 %v1888_v20  ;;  %1667 = vmatprep.subr.bf16.mxu0 %v1889_v21  ;;  %v1912_v20 = vld [vmem:[%s2412_s7] sm:$0xff]   ;;  %v1913_v21 = vld [vmem:[%s2412_s7 + $0x8] sm:$0xff]  }
 0x2f7   : > { %1646 = vmatpush3.bf16.msra.mxu1 %v1890_v22  ;;  %1668 = vmatpush3.bf16.msra.mxu0 %v1891_v23  ;;  %v1914_v22 = vld [vmem:[%s2412_s7 + $0x10] sm:$0xff]   ;;  %v1915_v23 = vld [vmem:[%s2412_s7 + $0x18] sm:$0xff]  }
 0x2f8   : > { %1647 = vmatprep.subr.bf16.mxu1 %v1892_v24  ;;  %1669 = vmatprep.subr.bf16.mxu0 %v1893_v25  ;;  %v1916_v24 = vld [vmem:[%s2412_s7 + $0x20] sm:$0xff]   ;;  %v1917_v25 = vld [vmem:[%s2412_s7 + $0x28] sm:$0xff]  }
 0x2fb   : > { %1648 = vmatpush3.bf16.msra.mxu1 %v1894_v26  ;;  %1670 = vmatpush3.bf16.msra.mxu0 %v1895_v27  ;;  %v1918_v26 = vld [vmem:[%s2412_s7 + $0x30] sm:$0xff]   ;;  %v1919_v27 = vld [vmem:[%s2412_s7 + $0x38] sm:$0xff]  }
 0x2fc   : > { %1649 = vmatprep.subr.bf16.mxu1 %v1896_v28  ;;  %1671 = vmatprep.subr.bf16.mxu0 %v1897_v29  ;;  %v1920_v28 = vld [vmem:[%s2413_s8] sm:$0xff]   ;;  %v1921_v29 = vld [vmem:[%s2413_s8 + $0x8] sm:$0xff]  }
 0x2ff   : > { %1650 = vmatpush3.bf16.msra.mxu1 %v1898_v30  ;;  %1672 = vmatpush3.bf16.msra.mxu0 %v1899_v31 }
 0x300   : > { %1651 = vmatprep.subr.bf16.mxu1 %v1900_v32  ;;  %1673 = vmatprep.subr.bf16.mxu0 %v1901_v33  ;;  %v877_v32 = vld [vmem:[%s2406_s1 + $0x4] ss:$0 sm:$0xff] }
 0x303   : > { %1652 = vmatpush3.bf16.msra.mxu1 %v1902_v34  ;;  %1674 = vmatpush3.bf16.msra.mxu0 %v1903_v35 }
 0x304   : > { %1653 = vmatprep.subr.bf16.mxu1 %v1904_v36  ;;  %1675 = vmatprep.subr.bf16.mxu0 %v1905_v37 }
 0x307   : > { %1654 = vmatpush3.bf16.msra.mxu1 %v1906_v38  ;;  %1676 = vmatpush3.bf16.msra.mxu0 %v1907_v39 }
 0x308   : > { %1655 = vmatprep.subr.bf16.mxu1 %v1908_v40  ;;  %1677 = vmatprep.subr.bf16.mxu0 %v1909_v41 }
 0x30b   : > { %1656 = vmatpush3.bf16.msra.mxu1 %v1910_v42  ;;  %1678 = vmatpush3.bf16.msra.mxu0 %v1911_v43 }
 0x30c   : > { %1725 = vmatprep.subr.bf16.mxu1 %v2066_v0  ;;  %1745 = vmatprep.subr.bf16.mxu0 %v2066_v0 }
 0x3c1   : > { %v817_v55 = vpop.f32.mrb[4].mxu1  ;;  %v860_v56 = vpop.f32.mrb[8].mxu0 }
 0x3c2   : > { %v818_v57 = vadd.f32 %v817_v55, %v606_v51  ;;  %v861_v58 = vadd.f32 %v860_v56, %v614_v52  ;;  %v819_v59 = vpop.f32.mrb[5].mxu1  ;;  %v862_v60 = vpop.f32.mrb[9].mxu0 }
 0x3c3   : > { %v820_v61 = vadd.f32 %v819_v59, %v610_v53  ;;  %v863_v62 = vadd.f32 %v862_v60, %v618_v54  ;;  %v821_v63 = vpop.f32.mrb[6].mxu1  ;;  %v864_v1 = vpop.f32.mrb[10].mxu0 }
 0x3c4   : > { %v822_v2 = vadd.f32 %v821_v63, %v606_v51  ;;  %v865_v3 = vadd.f32 %v864_v1, %v614_v52  ;;  %v823_v4 = vpop.f32.mrb[7].mxu1  ;;  %v866_v5 = vpop.f32.mrb[11].mxu0  ;;  %v869_v8 = vmax.f32 %v818_v57, 0.0  ;;  %v871_v9 = vmax.f32 %v861_v58, 0.0  ;;  %v1923_v51 = vld [vmem:[%s2413_s8 + $0x18] sm:$0xff]  }
 0x3c5   : > { %v824_v6 = vadd.f32 %v823_v4, %v610_v53  ;;  %v867_v7 = vadd.f32 %v866_v5, %v618_v54  ;;  %v870_v12 = vmax.f32 %v820_v61, 0.0  ;;  %v872_v13 = vmax.f32 %v863_v62, 0.0  ;;  %v1222_v52 = vld [vmem:[%s2406_s1 + $0x5] ss:$0 sm:$0xff] }
 0x3c6   : > { %v873_v10 = vmax.f32 %v822_v2, 0.0  ;;  %v875_v11 = vmax.f32 %v865_v3, 0.0 }
 0x3c7   : > { %v874_v14 = vmax.f32 %v824_v6, 0.0  ;;  %v876_v15 = vmax.f32 %v867_v7, 0.0 }
 0x3c8   : > { %v878_v16 = vpack.c.bf16 %v873_v10, %v869_v8  ;;  %v880_v17 = vpack.c.bf16 %v875_v11, %v871_v9 }
 0x3c9   : > { %v879_v18 = vpack.c.bf16 %v874_v14, %v870_v12  ;;  %v881_v19 = vpack.c.bf16 %v876_v15, %v872_v13 }
 0x3cb   : > { %1170 = vmatprep.mubr.bf16.mxu1 %v879_v18  ;;  %1211 = vmatprep.mubr.bf16.mxu0 %v881_v19 }
 0x3cc   : > { %1171 = vmatmul.mubr.bf16.vlgmr.msra.gmra.mrb[8].mxu1 %v878_v16  ;;  %1212 = vmatmul.mubr.bf16.vlgmr.msra.gmra.mrb[12].mxu0 %v880_v17 }
 0x3cd   : > { %1726 = vmatpush3.bf16.msra.mxu1 %v1912_v20  ;;  %1741 = vmatprep.mubr.msk.bf16.mxu1 %vm2067_vm0, %v2066_v0 }
 0x3ce   : > { %1727 = vmatprep.subr.bf16.mxu1 %v2066_v0  ;;  %1753 = vmatprep.mubr.msk.bf16.mxu0 %vm2067_vm0, %v2066_v0 }
 0x3cf   : > { %1746 = vmatpush3.bf16.msra.mxu0 %v1920_v28 }
 0x3d0   : > { %1747 = vmatprep.subr.bf16.mxu0 %v2066_v0 }
 0x3d1   : > { %1728 = vmatpush3.bf16.msra.mxu1 %v1913_v21 }
 0x3d2   : > { %1729 = vmatprep.subr.bf16.mxu1 %v2066_v0 }
 0x3d3   : > { %1748 = vmatpush3.bf16.msra.mxu0 %v1921_v29 }
 0x3d4   : > { %1749 = vmatprep.subr.bf16.mxu0 %v2066_v0 }
 0x3d5   : > { %1730 = vmatpush3.bf16.msra.mxu1 %v1914_v22 }
 0x3d6   : > { %1731 = vmatprep.subr.bf16.mxu1 %v2066_v0 }
 0x3d7   : > { %1750 = vmatpush3.bf16.msra.mxu0 %v1922_v50 }
 0x3d8   : > { %1751 = vmatprep.subr.bf16.mxu0 %v2066_v0 }
 0x3d9   : > { %1732 = vmatpush3.bf16.msra.mxu1 %v1915_v23 }
 0x3da   : > { %1733 = vmatprep.subr.bf16.mxu1 %v2066_v0 }
 0x3db   : > { %1752 = vmatpush3.bf16.msra.mxu0 %v1923_v51 }
 0x3dd   : > { %1734 = vmatpush3.bf16.msra.mxu1 %v1916_v24 }
 0x3de   : > { %1735 = vmatprep.subr.bf16.mxu1 %v2066_v0 }
 0x3e1   : > { %1736 = vmatpush3.bf16.msra.mxu1 %v1917_v25 }
 0x3e2   : > { %1737 = vmatprep.subr.bf16.mxu1 %v2066_v0 }
 0x3e5   : > { %1738 = vmatpush3.bf16.msra.mxu1 %v1918_v26 }
 0x3e6   : > { %1739 = vmatprep.subr.bf16.mxu1 %v2066_v0  ;;  %v1331_v0 = vld [vmem:[%s2406_s1 + $0x6] ss:$0 sm:$0xff] }
 0x3e9   : > { %1740 = vmatpush3.bf16.msra.mxu1 %v1919_v27 }
 0x49f   : > { %v1657_v30 = vpop.f32.mrb[8].mxu1  ;;  %v1679_v31 = vpop.f32.mrb[12].mxu0 }
 0x4a0   : > { %v1658_v33 = vpop.f32.mrb[9].mxu1  ;;  %v1680_v34 = vpop.f32.mrb[13].mxu0 }
 0x4a1   : > { %v1659_v35 = vadd.f32 %v1658_v33, %v1657_v30  ;;  %v1681_v36 = vadd.f32 %v1680_v34, %v1679_v31  ;;  %v1660_v37 = vpop.f32.mrb[10].mxu1  ;;  %v1682_v38 = vpop.f32.mrb[14].mxu0 }
 0x4a2   : > { %v1661_v39 = vpop.f32.mrb[11].mxu1  ;;  %v1683_v40 = vpop.f32.mrb[15].mxu0 }
 0x4a3   : > { %v1173_v41 = vadd.f32 %v1659_v35, %v877_v32  ;;  %v1662_v42 = vadd.f32 %v1661_v39, %v1660_v37  ;;  %v1684_v43 = vadd.f32 %v1683_v40, %v1682_v38 }
 0x4a5   : > { %v1214_v44 = vadd.f32 %v1681_v36, %v1173_v41  ;;  %v1176_v45 = vadd.f32 %v1662_v42, %v877_v32 }
 0x4a7   : > { %v1217_v46 = vadd.f32 %v1684_v43, %v1176_v45  ;;  %v1220_v47 = vmax.f32 %v1214_v44, 0.0 }
 0x4a9   : > { %v1221_v48 = vmax.f32 %v1217_v46, 0.0 }
 0x4ab   : > { %v1223_v49 = vpack.c.bf16 %v1221_v48, %v1220_v47 }
 0x4ad   : > { %1742 = vmatmul.mubr.bf16.vlgmr.msra.gmra.mrb[12].mxu1 %v1223_v49 }
 0x580   : > { %v1322_v53 = vpop.f32.mrb[12].mxu1 }
 0x581   : > { %v1323_v54 = vadd.f32 %v1322_v53, %v1222_v52  ;;  %v1743_v55 = vpop.f32.mrb[13].mxu1 }
 0x582   : > { %v1325_v56 = vpop.f32.mrb[14].mxu1 }
 0x583   : > { %v1326_v57 = vadd.f32 %v1325_v56, %v1222_v52  ;;  %v1744_v58 = vpop.f32.mrb[15].mxu1  ;;  %v1329_v59 = vmax.f32 %v1323_v54, 0.0 }
 0x585   : > { %v1330_v60 = vmax.f32 %v1326_v57, 0.0 }
 0x587   : > { %v1332_v61 = vpack.c.bf16 %v1330_v60, %v1329_v59 }
 0x589   : > { %1754 = vmatmul.mubr.msk.bf16.vlgmr.msra.gmra.mrb[16].mxu0 %vm520_vm4, %v1332_v61 }
 0x65c   : > { %v1402_v62 = vpop.f32.mrb[16].mxu0 }
 0x65d   : > { %v1403_v63 = vadd.f32 %v1402_v62, %v1331_v0  ;;  %v1755_v1 = vpop.f32.mrb[17].mxu0 }
 0x65e   : > { %v1405_v2 = vpop.f32.mrb[18].mxu0 }
 0x65f   : > { %1409 = vmax.xlane.f32.xlu0 %v1403_v63  ;;  %v1756_v3 = vpop.f32.mrb[19].mxu0  ;;  %v1406_v4 = vadd.f32 %v1405_v2, %v1331_v0 }
 0x663   : > { %1411 = vmax.xlane.f32.xlu0 %v1406_v4 }
 0x6ec   : > { %v1410_v5 = vpop.xlane.xlu0 %1409 }
 0x6ed   : > { %v1413_v6 = vsub.f32 %v1403_v63, %v1410_v5 }
 0x6ef   : > { %v1415_v7 = vmul.f32 1.442695, %v1413_v6 }
 0x6f0   : > { %v1412_v8 = vpop.xlane.xlu0 %1411 }
 0x6f1   : > { %1924 = vpow2.f32 %v1415_v7  ;;  %v1414_v9 = vsub.f32 %v1406_v4, %v1412_v8 }
 0x6f3   : > { %v1417_v10 = vmul.f32 1.442695, %v1414_v9 }
 0x6f5   : > { %1926 = vpow2.f32 %v1417_v10 }
 0x6fb   : > { %v1925_v11 = vpop.eup %1924 }
 0x6fc   : > { %1419 = vadd.xlane.f32.xlu1 %v1925_v11 }
 0x6ff   : > { %v1927_v12 = vpop.eup %1926 }
 0x700   : > { %1421 = vadd.xlane.f32.xlu1 %v1927_v12 }
 0x789   : > { %v1420_v13 = vpop.xlane.xlu1 %1419 }
 0x78a   : > { %1928 = vrcp.f32 %v1420_v13 }
 0x78d   : > { %v1422_v14 = vpop.xlane.xlu1 %1421 }
 0x78e   : > { %1930 = vrcp.f32 %v1422_v14 }
 0x794   : > { %v1929_v15 = vpop.eup %1928 }
 0x795   : > { %v1425_v16 = vmul.f32 %v1929_v15, %v1925_v11 }
 0x797   : > { %1427 = vst [vmem:[%s356_s24] sm:$0xff] %v1425_v16 }
 0x798   : > { %v1931_v17 = vpop.eup %1930 }
 0x799   : > { %v1426_v18 = vmul.f32 %v1931_v17, %v1927_v12 }
 0x79b   : > { %1428 = vst [vmem:[%s356_s24 + $0x8] sm:$0xff] %v1426_v18 }
 0x79c   : > { %2001 = shalt.err (!%p1998_p11)
}
 0x79d   : > { %s2002_s25 = scalar_lea.hbm %s2360_s29, 256  ;;  %s2006_s15 = scalar_lea.hbm %s2414_s9, 512 }
 0x79e   : > { %p2003_p13 = scmp.ne.s32.totalorder %s2360_s29, %s2002_s25  ;;  %p2007_p6 = scmp.lt.u32.totalorder %s2360_s29, %s2414_s9 }
 0x79f   : > { %p2008_p9 = scmp.lt.u32.totalorder %s2006_s15, %s2002_s25  ;;  %p2010_p10 = scmp.lt.u32.totalorder %s2002_s25, %s2360_s29 }
 0x7a0   : > { %p2004_p0 = pnand %p2003_p13, %p2433_p1 }
 0x7a1   : > { %p2009_p12 = por %p2008_p9, %p2007_p6 }
 0x7a2   : > { %p2005_p5 = pneg %p2004_p0 }
 0x7a3   : > { %p2011_p2 = por %p2010_p10, %p2009_p12 }
 0x7a5   : > { %p2012_p3 = pnand %p2011_p2, %p2005_p5 }
 0x7a7   : > { %2015 = shalt.err (!%p2012_p3)
}
 0x7a8   : > { %s2070_s24 = smov 128   ;;  %s2071_s26 = smov 8  }
 0x7a9   : > { %1765 = dma.vmem_to_hbm [thread:$0]  (%p2433_p1), %s2362_s21, 256, %s2360_s29, %s2364_s14, %s2070_s24, %s2070_s24, %s2071_s26  }
 0x7aa PF: > { %p1782_p4 = scmp.ge.s32.totalorder %s2058_s12, 2  ;;  %s1458_s28 = sand.u32 1, %s2046_s30  }
 0x7ab   : > { %p2434_p7 = scmp.ne.s32.totalorder %s2425_s20, 0  ;;  %s1459_s16 = scalar_lea.sflag [#allocation4], %s1458_s28 }
 0x7ad   : > { %p1775_p8 = pnand %p1782_p4, %p2434_p7 }
 0x7af   : > { %2041 = dma.done.wait (!%p1775_p8), %s1459_s16, 256  }
 0x7b0   : > { %2043 = vsyncadd (!%p1775_p8), %s1459_s16, 4294967040  ;;  %s2435_s12 = sld [smem:[#allocation12_spill]]  ;;  %s2436_s13 = sld [smem:[#allocation11_spill]] }
 0x7b1   : > { %s2437_s11 = sld [smem:[#allocation13_spill]]  ;;  %s2438_s30 = smov %s2050_s10 }
 0x7b6   : > { %p21_p11 = scmp.ge.s32.totalorder %s2435_s12, 4   ;;  %s2439_s10 = smov %s2436_s13 }
 0x7b8   :  { %23 = sbr.rel (!%p21_p11) target bundleno = 5 (0x5), region = 101 }
 0x7bf   :  { %1464 = vsyncpa [#allocation3], 1 }
 0x7c0   :  { %1466 = vsyncpa [#allocation3 + $0x1], 1 }
 0x7c1   :  { %1467 = vsyncpa [#allocation6], 1 }
 0x7c2   :  { %1468 = vsyncpa [#allocation4], 1 }
 0x7c3   :  { %1470 = vsyncpa [#allocation4 + $0x1], 1 }

</bundles_post_ra>
